<compile_context>
chip_gen: v7x
topology: tpu7x:2x2x1
jax: 0.10.0
libtpu: 0.0.40
codegen_flags: <defaults>
</compile_context>

<pallas_src>
import functools
import math

import jax
import jax.numpy as jnp
from jax import lax
from jax.experimental import pallas as pl
from jax.experimental.pallas import tpu as pltpu


_SQRT2_INV = 1.0 / math.sqrt(2.0)


def _gelu_exact(h):
    # PyTorch nn.GELU default: exact erf form.
    return 0.5 * h * (1.0 + lax.erf(h * _SQRT2_INV))


def _ffn_kernel(x_ref, w1t_ref, t1_ref, w2t_ref, t2_ref, o_ref, *scratch,
                hidden_chunk, n_chunks):
    x_in = x_ref[...]                              # (Cin, tn), input dtype
    x_bf = x_in.astype(jnp.bfloat16)               # MXU operand

    if n_chunks == 1:
        # Small hidden dim: single straight-line pass, no accumulator scratch.
        h = jnp.dot(w1t_ref[...].astype(jnp.bfloat16), x_bf,
                    preferred_element_type=jnp.float32)          # (hidden, tn) f32
        h = _gelu_exact(h + t1_ref[...])
        y = jnp.dot(w2t_ref[...].astype(jnp.bfloat16), h.astype(jnp.bfloat16),
                    preferred_element_type=jnp.float32)          # (Cout, tn) f32
        y = y + t2_ref[...]
    else:
        acc_ref, = scratch
        acc_ref[...] = jnp.zeros_like(acc_ref)

        def body(c, carry):
            off = pl.multiple_of(c * hidden_chunk, hidden_chunk)
            w1c = w1t_ref[pl.ds(off, hidden_chunk), :].astype(jnp.bfloat16)
            hc = jnp.dot(w1c, x_bf, preferred_element_type=jnp.float32)
            hc = _gelu_exact(hc + t1_ref[pl.ds(off, hidden_chunk), :])
            w2c = w2t_ref[:, pl.ds(off, hidden_chunk)].astype(jnp.bfloat16)
            acc_ref[...] += jnp.dot(w2c, hc.astype(jnp.bfloat16),
                                    preferred_element_type=jnp.float32)
            return carry

        lax.fori_loop(0, n_chunks, body, 0)
        y = acc_ref[...] + t2_ref[...]

    # drop_path == Identity (drop_path=0.0): residual add with the input tile.
    o_ref[...] = (y + x_in.astype(jnp.float32)).astype(o_ref.dtype)


def _vmem_capacity_bytes():
    try:
        info = pltpu.get_tpu_info()
        cap = getattr(info, "vmem_capacity_bytes", None)
        if cap:
            return int(cap)
    except Exception:
        pass
    return 64 << 20   # conservative: v7x per-TensorCore VMEM


def _pick_hidden_chunk(hidden):
    if hidden <= 1024:
        return hidden
    for c in (1024, 512, 768, 256, 384, 128):   # prefer multiples of 256 (v6e/v7x MXU)
        if hidden % c == 0:
            return c
    return hidden


def _plan_bytes(Cin, Cout, hidden, hidden_chunk, tn, x_itemsize, w_itemsize,
                single_buffer_weights):
    wbuf = 1 if single_buffer_weights else 2
    n_chunks = hidden // hidden_chunk
    x_tile = Cin * tn * x_itemsize * 2            # double-buffered input tile
    o_tile = Cout * tn * x_itemsize * 2           # double-buffered output tile
    weights = (hidden * Cin + Cout * hidden) * w_itemsize * wbuf
    shifts = (hidden + Cout) * 128 * 4 * wbuf     # (C,1) pads lanes to 128
    acc = Cout * tn * 4 if n_chunks > 1 else 0
    h_live = hidden_chunk * tn * 4 * 3            # h chunk + GELU temporaries headroom
    return x_tile + o_tile + weights + shifts + acc + h_live + (2 << 20)


def _pick_spatial_tile(hw_pad, batch, plan_fn, budget):
    cands = [t for t in range(128, hw_pad + 1, 128) if hw_pad % t == 0]
    cands.sort(reverse=True)
    fitting = [t for t in cands if plan_fn(t) <= budget]
    if not fitting:
        return cands[-1]                          # smallest tile; vmem limit is raised
    tn = fitting[0]
    if batch * (hw_pad // tn) < 2:                # keep both v7x TensorCores busy
        for t in fitting:
            if batch * (hw_pad // t) >= 2:
                tn = t
                break
    return tn


def ffn_pallas(x_nchw, params, *, tn=None):
    """x_nchw: (B, Cin, H, W).  Returns (B, Cout, H, W) with Cout == Cin."""
    B, Cin, H, W = x_nchw.shape
    w1t, t1, w2t, t2 = params
    hidden = w1t.shape[0]
    Cout = w2t.shape[0]
    assert Cout == Cin, "residual requires out_features == in_features"

    HW = H * W
    HW_pad = ((HW + 127) // 128) * 128
    # NCHW -> (B, Cin, H*W): contiguous reshape, no transpose / extra HBM traffic.
    x3d = x_nchw.reshape(B, Cin, HW)
    if HW_pad != HW:
        # Pad spatial so every tile stays lane-dense; padded columns are cropped below.
        x3d = jnp.pad(x3d, ((0, 0), (0, 0), (0, HW_pad - HW)))

    hidden_chunk = _pick_hidden_chunk(hidden)
    n_chunks = hidden // hidden_chunk

    capacity = _vmem_capacity_bytes()
    budget = (capacity * 3) // 4
    x_itemsize = jnp.dtype(x_nchw.dtype).itemsize
    w_itemsize = jnp.dtype(w1t.dtype).itemsize

    def plan_fn(t, single=True):
        return _plan_bytes(Cin, Cout, hidden, hidden_chunk, t,
                           x_itemsize, w_itemsize, single)

    if tn is None:
        tn = _pick_spatial_tile(HW_pad, B, plan_fn, budget)
    assert HW_pad % tn == 0, "spatial tile must divide the padded H*W"

    def build(single_buffer_weights):
        wmode = ({"pipeline_mode": pl.Buffered(1)} if single_buffer_weights else {})
        plan = plan_fn(tn, single_buffer_weights)
        vmem_limit = int(max(32 << 20, min((capacity * 9) // 10, plan * 2)))
        scratch = ([pltpu.VMEM((Cout, tn), jnp.float32)] if n_chunks > 1 else [])
        kernel = functools.partial(_ffn_kernel, hidden_chunk=hidden_chunk,
                                   n_chunks=n_chunks)
        return pl.pallas_call(
            kernel,
            out_shape=jax.ShapeDtypeStruct((B, Cout, HW_pad), x_nchw.dtype),
            grid_spec=pltpu.PrefetchScalarGridSpec(
                num_scalar_prefetch=0,
                grid=(B, HW_pad // tn),
                in_specs=[
                    # x tile: batch squeezed, channels whole, lane-dense spatial tile
                    pl.BlockSpec((None, Cin, tn), lambda b, j: (b, 0, j)),
                    # grid-invariant operands: BN-scale-folded weights + shifts
                    pl.BlockSpec((hidden, Cin), lambda b, j: (0, 0), **wmode),
                    pl.BlockSpec((hidden, 1), lambda b, j: (0, 0), **wmode),
                    pl.BlockSpec((Cout, hidden), lambda b, j: (0, 0), **wmode),
                    pl.BlockSpec((Cout, 1), lambda b, j: (0, 0), **wmode),
                ],
                out_specs=pl.BlockSpec((None, Cout, tn), lambda b, j: (b, 0, j)),
                scratch_shapes=scratch,
            ),
            compiler_params=pltpu.CompilerParams(
                dimension_semantics=("parallel", "parallel"),
                vmem_limit_bytes=vmem_limit),
        )

    try:
        out3d = build(True)(x3d, w1t, t1, w2t, t2)
    except Exception:
        # Fallback for jax versions without BlockSpec pipeline_mode support:
        # default double-buffered weight specs (functionally identical).
        out3d = build(False)(x3d, w1t, t1, w2t, t2)

    if HW_pad != HW:
        out3d = out3d[:, :, :HW]
    return out3d.reshape(B, Cout, H, W)


def make_ffn_params(key, in_features, hidden_features=None, out_features=None,
                    eps=1e-5, weight_dtype=jnp.bfloat16):
    """Deterministic synthetic parameters with BN (inference) folded.

    Conv weight in matmul form (cout, cin).  Folding:
      BN(W x + b) = (W x + b - mean) * gamma/sqrt(var+eps) + beta
                  = (scale*W) x + shift
      scale = gamma / sqrt(var+eps)          (folded into weight rows, cast to bf16)
      shift = (b - mean) * scale + beta      (kept as an f32 (cout,1) column add)
    """
    out_features = out_features or in_features
    hidden_features = hidden_features or in_features
    ks = jax.random.split(key, 4)

    def layer(kw, kb, cin, cout):
        w = jax.random.normal(kw, (cout, cin), jnp.float32) * (1.0 / math.sqrt(cin))
        b_conv = jax.random.normal(kb, (cout,), jnp.float32) * 0.1
        gamma = 1.0 + 0.05 * jnp.arange(cout, dtype=jnp.float32)
        beta = 0.01 * jnp.arange(cout, dtype=jnp.float32)
        running_mean = 0.02 * jnp.arange(cout, dtype=jnp.float32)
        running_var = 1.0 + 0.03 * jnp.arange(cout, dtype=jnp.float32)
        rstd = 1.0 / jnp.sqrt(running_var + eps)
        scale = gamma * rstd
        wt = (w * scale[:, None]).astype(weight_dtype)               # (cout, cin)
        shift = ((b_conv - running_mean) * scale + beta)[:, None]    # (cout, 1) f32
        return wt, shift

    w1t, t1 = layer(ks[0], ks[1], in_features, hidden_features)
    w2t, t2 = layer(ks[2], ks[3], hidden_features, out_features)
    return (w1t, t1, w2t, t2)


def ffn_reference(x_nchw, params):
    """Plain-JAX reference mirroring the kernel's bf16-matmul / f32-accumulate math."""
    w1t, t1, w2t, t2 = params
    B, Cin, H, W = x_nchw.shape
    x = x_nchw.reshape(B, Cin, H * W)
    xb = x.astype(jnp.bfloat16)
    h = jnp.einsum('hc,bcn->bhn', w1t.astype(jnp.bfloat16), xb,
                   preferred_element_type=jnp.float32) + t1[None].astype(jnp.float32)
    h = 0.5 * h * (1.0 + lax.erf(h / math.sqrt(2.0)))
    y = jnp.einsum('oh,bhn->bon', w2t.astype(jnp.bfloat16), h.astype(jnp.bfloat16),
                   preferred_element_type=jnp.float32) + t2[None].astype(jnp.float32)
    y = y + x.astype(jnp.float32)
    return y.reshape(B, -1, H, W).astype(x_nchw.dtype)


if __name__ == "__main__":
    key = jax.random.PRNGKey(0)
    k_x, k_p = jax.random.split(key)

    B, Cin, H, W = 2, 4, 16, 16
    hidden = 32
    x = jax.random.normal(k_x, (B, Cin, H, W), jnp.float32)

    params = make_ffn_params(k_p, in_features=Cin, hidden_features=hidden)

    out = jax.block_until_ready(ffn_pallas(x, params))
    ref = ffn_reference(x, params)

    assert out.shape == (B, Cin, H, W)
    assert jnp.allclose(out, ref, atol=1e-2, rtol=1e-2), "mismatch vs reference"

    print("KERNEL_OK")
</pallas_src>

<mosaic_0001>
module attributes {stable_mosaic.version = 11 : i64} {
  func.func @_ffn_kernel(%arg0: i32, %arg1: i32, %arg2: memref<1x4x256xf32, #tpu.memory_space<vmem>>, %arg3: memref<32x4xbf16, #tpu.memory_space<vmem>>, %arg4: memref<32x1xf32, #tpu.memory_space<vmem>>, %arg5: memref<4x32xbf16, #tpu.memory_space<vmem>>, %arg6: memref<4x1xf32, #tpu.memory_space<vmem>>, %arg7: memref<1x4x256xf32, #tpu.memory_space<vmem>>) attributes {dimension_semantics = [#tpu.dimension_semantics<parallel>, #tpu.dimension_semantics<parallel>], iteration_bounds = array<i64: 2, 1>, scalar_prefetch = 0 : i64, scratch_operands = 0 : i64, tpu.core_type = #tpu.core_type<tc>, window_params = [{transform_indices = @transform_0, window_bounds = array<i64: 1, 4, 256>}, {pipeline_mode = #tpu.pipeline_mode<synchronous>, transform_indices = @transform_1, window_bounds = array<i64: 32, 4>}, {pipeline_mode = #tpu.pipeline_mode<synchronous>, transform_indices = @transform_2, window_bounds = array<i64: 32, 1>}, {pipeline_mode = #tpu.pipeline_mode<synchronous>, transform_indices = @transform_3, window_bounds = array<i64: 4, 32>}, {pipeline_mode = #tpu.pipeline_mode<synchronous>, transform_indices = @transform_4, window_bounds = array<i64: 4, 1>}, {transform_indices = @transform_5, window_bounds = array<i64: 1, 4, 256>}]} {
    %c0 = arith.constant 0 : index
    %c0_0 = arith.constant 0 : index
    %c0_1 = arith.constant 0 : index
    %0 = vector.load %arg2[%c0, %c0_0, %c0_1] : memref<1x4x256xf32, #tpu.memory_space<vmem>>, vector<1x4x256xf32>
    %1 = vector.shape_cast %0 : vector<1x4x256xf32> to vector<4x256xf32>
    %2 = arith.truncf %1 : vector<4x256xf32> to vector<4x256xbf16>
    %c0_2 = arith.constant 0 : index
    %c0_3 = arith.constant 0 : index
    %3 = vector.load %arg3[%c0_2, %c0_3] : memref<32x4xbf16, #tpu.memory_space<vmem>>, vector<32x4xbf16>
    %cst = arith.constant dense<0.000000e+00> : vector<32x256xf32>
    %4 = tpu.matmul %3, %2, %cst {dimension_numbers = #tpu.dot_dimension_numbers<[1], [0], [0], [1], [0, 0, 1, 1], [], []>} : vector<32x4xbf16>, vector<4x256xbf16>, vector<32x256xf32> -> vector<32x256xf32>
    %c0_4 = arith.constant 0 : index
    %c0_5 = arith.constant 0 : index
    %5 = vector.load %arg4[%c0_4, %c0_5] : memref<32x1xf32, #tpu.memory_space<vmem>>, vector<32x1xf32>
    %6 = vector.broadcast %5 : vector<32x1xf32> to vector<32x256xf32>
    %7 = arith.addf %4, %6 : vector<32x256xf32>
    %cst_6 = arith.constant 5.000000e-01 : f32
    %8 = vector.broadcast %cst_6 : f32 to vector<32x256xf32>
    %9 = arith.mulf %8, %7 : vector<32x256xf32>
    %cst_7 = arith.constant 0.707106769 : f32
    %10 = vector.broadcast %cst_7 : f32 to vector<32x256xf32>
    %11 = arith.mulf %7, %10 : vector<32x256xf32>
    %12 = math.erf %11 : vector<32x256xf32>
    %cst_8 = arith.constant 1.000000e+00 : f32
    %13 = vector.broadcast %cst_8 : f32 to vector<32x256xf32>
    %14 = arith.addf %13, %12 : vector<32x256xf32>
    %15 = arith.mulf %9, %14 : vector<32x256xf32>
    %c0_9 = arith.constant 0 : index
    %c0_10 = arith.constant 0 : index
    %16 = vector.load %arg5[%c0_9, %c0_10] : memref<4x32xbf16, #tpu.memory_space<vmem>>, vector<4x32xbf16>
    %17 = arith.truncf %15 : vector<32x256xf32> to vector<32x256xbf16>
    %cst_11 = arith.constant dense<0.000000e+00> : vector<4x256xf32>
    %18 = tpu.matmul %16, %17, %cst_11 {dimension_numbers = #tpu.dot_dimension_numbers<[1], [0], [0], [1], [0, 0, 1, 1], [], []>} : vector<4x32xbf16>, vector<32x256xbf16>, vector<4x256xf32> -> vector<4x256xf32>
    %c0_12 = arith.constant 0 : index
    %c0_13 = arith.constant 0 : index
    %19 = vector.load %arg6[%c0_12, %c0_13] : memref<4x1xf32, #tpu.memory_space<vmem>>, vector<4x1xf32>
    %20 = vector.broadcast %19 : vector<4x1xf32> to vector<4x256xf32>
    %21 = arith.addf %18, %20 : vector<4x256xf32>
    %22 = arith.addf %21, %1 : vector<4x256xf32>
    %c0_14 = arith.constant 0 : index
    %c0_15 = arith.constant 0 : index
    %c0_16 = arith.constant 0 : index
    %23 = vector.load %arg7[%c0_14, %c0_15, %c0_16] : memref<1x4x256xf32, #tpu.memory_space<vmem>>, vector<1x4x256xf32>
    %24 = vector.shape_cast %23 : vector<1x4x256xf32> to vector<4x256xf32>
    %25 = vector.shape_cast %22 : vector<4x256xf32> to vector<1x4x256xf32>
    tpu.vector_store %arg7[%c0_14, %c0_15, %c0_16], %25 {strides = array<i32>} : memref<1x4x256xf32, #tpu.memory_space<vmem>>, vector<1x4x256xf32>,
    return
  }
  func.func @transform_0(%arg0: i32, %arg1: i32) -> (i32, i32, i32) {
    %c0_i32 = arith.constant 0 : i32
    %c0_i32_0 = arith.constant 0 : i32
    return %arg0, %c0_i32, %arg1 : i32, i32, i32
  }
  func.func @transform_1(%arg0: i32, %arg1: i32) -> (i32, i32) {
    %c0_i32 = arith.constant 0 : i32
    %c0_i32_0 = arith.constant 0 : i32
    %c0_i32_1 = arith.constant 0 : i32
    return %c0_i32, %c0_i32_0 : i32, i32
  }
  func.func @transform_2(%arg0: i32, %arg1: i32) -> (i32, i32) {
    %c0_i32 = arith.constant 0 : i32
    %c0_i32_0 = arith.constant 0 : i32
    %c0_i32_1 = arith.constant 0 : i32
    return %c0_i32, %c0_i32_0 : i32, i32
  }
  func.func @transform_3(%arg0: i32, %arg1: i32) -> (i32, i32) {
    %c0_i32 = arith.constant 0 : i32
    %c0_i32_0 = arith.constant 0 : i32
    %c0_i32_1 = arith.constant 0 : i32
    return %c0_i32, %c0_i32_0 : i32, i32
  }
  func.func @transform_4(%arg0: i32, %arg1: i32) -> (i32, i32) {
    %c0_i32 = arith.constant 0 : i32
    %c0_i32_0 = arith.constant 0 : i32
    %c0_i32_1 = arith.constant 0 : i32
    return %c0_i32, %c0_i32_0 : i32, i32
  }
  func.func @transform_5(%arg0: i32, %arg1: i32) -> (i32, i32, i32) {
    %c0_i32 = arith.constant 0 : i32
    %c0_i32_0 = arith.constant 0 : i32
    return %arg0, %c0_i32, %arg1 : i32, i32, i32
  }
}

module attributes {stable_mosaic.version = 11 : i64} {
  func.func @_ffn_kernel(%arg0: i32, %arg1: i32, %arg2: memref<1x4x256xf32, #tpu.memory_space<vmem>>, %arg3: memref<32x4xbf16, #tpu.memory_space<vmem>>, %arg4: memref<32x1xf32, #tpu.memory_space<vmem>>, %arg5: memref<4x32xbf16, #tpu.memory_space<vmem>>, %arg6: memref<4x1xf32, #tpu.memory_space<vmem>>, %arg7: memref<1x4x256xf32, #tpu.memory_space<vmem>>) attributes {dimension_semantics = [#tpu.dimension_semantics<parallel>, #tpu.dimension_semantics<parallel>], iteration_bounds = array<i64: 2, 1>, scalar_prefetch = 0 : i64, scratch_operands = 0 : i64, tpu.core_type = #tpu.core_type<tc>, window_params = [{transform_indices = @transform_0, window_bounds = array<i64: 1, 4, 256>}, {pipeline_mode = #tpu.pipeline_mode<synchronous>, transform_indices = @transform_1, window_bounds = array<i64: 32, 4>}, {pipeline_mode = #tpu.pipeline_mode<synchronous>, transform_indices = @transform_2, window_bounds = array<i64: 32, 1>}, {pipeline_mode = #tpu.pipeline_mode<synchronous>, transform_indices = @transform_3, window_bounds = array<i64: 4, 32>}, {pipeline_mode = #tpu.pipeline_mode<synchronous>, transform_indices = @transform_4, window_bounds = array<i64: 4, 1>}, {transform_indices = @transform_5, window_bounds = array<i64: 1, 4, 256>}]} {
    %c0 = arith.constant 0 : index
    %c0_0 = arith.constant 0 : index
    %c0_1 = arith.constant 0 : index
    %0 = vector.load %arg2[%c0, %c0_0, %c0_1] : memref<1x4x256xf32, #tpu.memory_space<vmem>>, vector<1x4x256xf32>
    %1 = vector.shape_cast %0 : vector<1x4x256xf32> to vector<4x256xf32>
    %2 = arith.truncf %1 : vector<4x256xf32> to vector<4x256xbf16>
    %c0_2 = arith.constant 0 : index
    %c0_3 = arith.constant 0 : index
    %3 = vector.load %arg3[%c0_2, %c0_3] : memref<32x4xbf16, #tpu.memory_space<vmem>>, vector<32x4xbf16>
    %cst = arith.constant dense<0.000000e+00> : vector<32x256xf32>
    %4 = tpu.matmul %3, %2, %cst {dimension_numbers = #tpu.dot_dimension_numbers<[1], [0], [0], [1], [0, 0, 1, 1], [], []>} : vector<32x4xbf16>, vector<4x256xbf16>, vector<32x256xf32> -> vector<32x256xf32>
    %c0_4 = arith.constant 0 : index
    %c0_5 = arith.constant 0 : index
    %5 = vector.load %arg4[%c0_4, %c0_5] : memref<32x1xf32, #tpu.memory_space<vmem>>, vector<32x1xf32>
    %6 = vector.broadcast %5 : vector<32x1xf32> to vector<32x256xf32>
    %7 = arith.addf %4, %6 : vector<32x256xf32>
    %cst_6 = arith.constant 5.000000e-01 : f32
    %8 = vector.broadcast %cst_6 : f32 to vector<32x256xf32>
    %9 = arith.mulf %8, %7 : vector<32x256xf32>
    %cst_7 = arith.constant 0.707106769 : f32
    %10 = vector.broadcast %cst_7 : f32 to vector<32x256xf32>
    %11 = arith.mulf %7, %10 : vector<32x256xf32>
    %12 = math.erf %11 : vector<32x256xf32>
    %cst_8 = arith.constant 1.000000e+00 : f32
    %13 = vector.broadcast %cst_8 : f32 to vector<32x256xf32>
    %14 = arith.addf %13, %12 : vector<32x256xf32>
    %15 = arith.mulf %9, %14 : vector<32x256xf32>
    %c0_9 = arith.constant 0 : index
    %c0_10 = arith.constant 0 : index
    %16 = vector.load %arg5[%c0_9, %c0_10] : memref<4x32xbf16, #tpu.memory_space<vmem>>, vector<4x32xbf16>
    %17 = arith.truncf %15 : vector<32x256xf32> to vector<32x256xbf16>
    %cst_11 = arith.constant dense<0.000000e+00> : vector<4x256xf32>
    %18 = tpu.matmul %16, %17, %cst_11 {dimension_numbers = #tpu.dot_dimension_numbers<[1], [0], [0], [1], [0, 0, 1, 1], [], []>} : vector<4x32xbf16>, vector<32x256xbf16>, vector<4x256xf32> -> vector<4x256xf32>
    %c0_12 = arith.constant 0 : index
    %c0_13 = arith.constant 0 : index
    %19 = vector.load %arg6[%c0_12, %c0_13] : memref<4x1xf32, #tpu.memory_space<vmem>>, vector<4x1xf32>
    %20 = vector.broadcast %19 : vector<4x1xf32> to vector<4x256xf32>
    %21 = arith.addf %18, %20 : vector<4x256xf32>
    %22 = arith.addf %21, %1 : vector<4x256xf32>
    %c0_14 = arith.constant 0 : index
    %c0_15 = arith.constant 0 : index
    %c0_16 = arith.constant 0 : index
    %23 = vector.load %arg7[%c0_14, %c0_15, %c0_16] : memref<1x4x256xf32, #tpu.memory_space<vmem>>, vector<1x4x256xf32>
    %24 = vector.shape_cast %23 : vector<1x4x256xf32> to vector<4x256xf32>
    %25 = vector.shape_cast %22 : vector<4x256xf32> to vector<1x4x256xf32>
    tpu.vector_store %arg7[%c0_14, %c0_15, %c0_16], %25 {strides = array<i32>} : memref<1x4x256xf32, #tpu.memory_space<vmem>>, vector<1x4x256xf32>,
    return
  }
  func.func @transform_0(%arg0: i32, %arg1: i32) -> (i32, i32, i32) {
    %c0_i32 = arith.constant 0 : i32
    %c0_i32_0 = arith.constant 0 : i32
    return %arg0, %c0_i32, %arg1 : i32, i32, i32
  }
  func.func @transform_1(%arg0: i32, %arg1: i32) -> (i32, i32) {
    %c0_i32 = arith.constant 0 : i32
    %c0_i32_0 = arith.constant 0 : i32
    %c0_i32_1 = arith.constant 0 : i32
    return %c0_i32, %c0_i32_0 : i32, i32
  }
  func.func @transform_2(%arg0: i32, %arg1: i32) -> (i32, i32) {
    %c0_i32 = arith.constant 0 : i32
    %c0_i32_0 = arith.constant 0 : i32
    %c0_i32_1 = arith.constant 0 : i32
    return %c0_i32, %c0_i32_0 : i32, i32
  }
  func.func @transform_3(%arg0: i32, %arg1: i32) -> (i32, i32) {
    %c0_i32 = arith.constant 0 : i32
    %c0_i32_0 = arith.constant 0 : i32
    %c0_i32_1 = arith.constant 0 : i32
    return %c0_i32, %c0_i32_0 : i32, i32
  }
  func.func @transform_4(%arg0: i32, %arg1: i32) -> (i32, i32) {
    %c0_i32 = arith.constant 0 : i32
    %c0_i32_0 = arith.constant 0 : i32
    %c0_i32_1 = arith.constant 0 : i32
    return %c0_i32, %c0_i32_0 : i32, i32
  }
  func.func @transform_5(%arg0: i32, %arg1: i32) -> (i32, i32, i32) {
    %c0_i32 = arith.constant 0 : i32
    %c0_i32_0 = arith.constant 0 : i32
    return %arg0, %c0_i32, %arg1 : i32, i32, i32
  }
}

</mosaic_0001>

<bundles_post_ra>
// kernel: tpu_custom_call.1
= control target key start
LH: loop header
LB: loop body
LE: loop exit
PB: predicated region body
PF: predicated region fallthrough
CT: control target
= control target key end

     0   :  { %10 = vsyncpa [#allocation3], 0  ;;  %s920_s0 = inlined_call_operand.vmem [shape: f32[2,4,256], index: 0, kind: input, shape index: {}]   ;;  %s921_s1 = inlined_call_operand.vmem [shape: bf16[32,4], index: 1, kind: input, shape index: {}]   ;;  %s922_s2 = inlined_call_operand.vmem [shape: f32[32,1], index: 2, kind: input, shape index: {}]   ;;  %s923_s3 = inlined_call_operand.vmem [shape: bf16[4,32], index: 3, kind: input, shape index: {}]   ;;  %s924_s4 = inlined_call_operand.vmem [shape: f32[4,1], index: 4, kind: input, shape index: {}]   ;;  %s925_s5 = inlined_call_operand.hbm [shape: f32[2,4,256], index: 5, kind: output, shape index: {}]  }
   0x1   :  { %12 = vsyncpa [#allocation3 + $0x1], 0  ;;  %s772_s18 = smov 0   ;;  %s774_s19 = smov 0  }
   0x2   :  { %s776_s20 = smov 0   ;;  %s778_s21 = smov 0  }
   0x3   :  { %s780_s22 = smov 0   ;;  %s782_s23 = smov 0  }
   0x4 LB: > { %s562_s24 = sadd.s32 4294967295, %s738_s23   ;;  %s563_s25 = sadd.s32 4294967294, %s738_s23   ;;  %s738_s23 = sphi %s782_s23, %s18_s23   ;;  %s734_s22 = sphi %s780_s22, %s932_s22   ;;  %s730_s21 = sphi %s778_s21, %s931_s21   ;;  %s726_s20 = sphi %s776_s20, %s930_s20   ;;  %s722_s19 = sphi %s774_s19, %s929_s19   ;;  %s718_s18 = sphi %s772_s18, %s928_s18  }
   0x5   : > { %s30_s26 = sadd.s32 1, %s734_s22  ;;  %s151_s27 = sadd.s32 1, %s726_s20 }
   0x6   : > { %p32_p0 = scmp.ge.s32.totalorder %s30_s26, 2  ;;  %p161_p1 = scmp.ne.s32.totalorder %s726_s20, %s722_s19 }
   0x7   : > { %p162_p2 = scmp.eq.s32.totalorder %s562_s24, 1  ;;  %p167_p3 = scmp.ne.s32.totalorder %s722_s19, %s718_s18 }
   0x8   : > { %s934_s26 = smov (%p32_p0, %s30_s26), 0  ;;  %p168_p5 = scmp.eq.s32.totalorder %s563_s25, 1 }
   0x9   : > { %p812_p4 = por %p162_p2, %p161_p1  ;;  %s146_s29 = ssub.s32 %s734_s22, %s934_s26 }
   0xa   : > { %p566_p6 = scmp.ge.s32.totalorder %s738_s23, 1  ;;  %p149_p7 = scmp.eq.s32.totalorder %s146_s29, 0 }
   0xb   : > { %p819_p8 = por %p168_p5, %p167_p3  ;;  %p211_p9 = scmp.lt.s32.totalorder %s738_s23, 3 }
   0xc   : > { %s825_s6 = scalar_select %p149_p7, %s726_s20, %s151_s27  }
   0xd   : > { %p212_p10 = pnand %p566_p6, %p211_p9 }
   0xe   : > { %p244_p11 = scmp.lt.s32.totalorder (!%p212_p10), %s730_s21, 1  ;;  %v740_v0 = vmov (!%p212_p10), 0   ;;  %v265_v1 = vld [vmem:[%s922_s2] sm:$0xff] (!%p212_p10)  ;;  %v267_v2 = vld [vmem:[%s922_s2 + $0x10] sm:$0xff] (!%p212_p10)  ;;  %v266_v3 = vld [vmem:[%s922_s2 + $0x8] sm:$0xff] (!%p212_p10)  ;;  %vm306_vm0 = vcmask (!%p212_p10), 1041408  }
   0xf   : > { %215 = sbr.rel (%p212_p10) target bundleno = 516 (0x204), region = 40  ;;  %345 = vmatprep.mubr.bf16.mxu0 (!%p212_p10), %v740_v0  ;;  %639 = vset.pattern.permute.xlu0 (!%p212_p10), %v740_v0  ;;  %v268_v4 = vld [vmem:[%s922_s2 + $0x18] sm:$0xff] (!%p212_p10)  ;;  %v411_v8 = vld [vmem:[%s924_s4] sm:$0xf] (!%p212_p10)  ;;  %vm299_vm1 = vcmask (!%p212_p10), 31744   ;;  %v643_v12 = vld [vmem:[%s921_s1 + $0x8] sm:$0xff] (!%p212_p10)  }
  0x10   : > { %640 = vset.pattern.permute.xlu1 (!%p212_p10), %v740_v0  ;;  %453 = vmatprep.mubr.bf16.mxu1 (!%p212_p10), %v740_v0  ;;  %v642_v11 = vld [vmem:[%s921_s1] sm:$0xff] (!%p212_p10)   ;;  %vm417_vm2 = vcmask (!%p212_p10), 261120   ;;  %s240_s13 = sand.u32 (!%p212_p10), 1, %s722_s19   ;;  %s582_s15 = sshll.u32 (!%p212_p10), %s730_s21, 7 }
  0x11   : > { %271 = vperm.xlu0 (!%p212_p10), %639, %v265_v1   ;;  %281 = vperm.xlu1 (!%p212_p10), %640, %v267_v2   ;;  %s567_s14 = sshll.u32 (!%p212_p10), %s240_s13, 3  ;;  %s873_s27 = scalar_lea.hbm (!%p212_p10), %s925_s5, %s582_s15 }
  0x12   : > { %s242_s16 = scalar_lea.vmem (!%p212_p10), [#allocation2], %s567_s14  ;;  %s470_s29 = scalar_lea.sflag (!%p212_p10), [#allocation3], %s240_s13 }
  0x15   : > { %276 = vperm.xlu0 (!%p212_p10), %639, %v266_v3   ;;  %286 = vperm.xlu1 (!%p212_p10), %640, %v268_v4  }
  0x16   : > { %s245_s7 = scalar_select %p244_p11, %s730_s21, 1 }
  0x17   : > { %s741_s21 = smov [#allocation2]  }
  0x18   : > { %s581_s12 = sshll.u32 %s245_s7, 3  ;;  %s664_s8 = sshll.u32 %s741_s21, 4  ;;  %s665_s8 = int_to_ptr.vmem [resolvable:$false] %s664_s8 }
  0x19   : > { %s251_s17 = scalar_lea.vmem %s920_s0, %s581_s12  ;;  %414 = vperm.xlu0 %639, %v411_v8   ;;  %s666_s9 = scalar_lea.vmem %s665_s8, 256 }
  0x1a   : > { %v844_v5 = vld [vmem:[%s251_s17] sm:$0xff]  ;;  %s486_s17 = sshll.u32 %s242_s16, 4  ;;  %s875_s17 = int_to_ptr.vmem [resolvable:$true] %s486_s17 }
  0x1b   : > { %v848_v6 = vcombine.high %v844_v5, %v844_v5  ;;  %v259_v7 = vpack.c.bf16 %v844_v5, %v844_v5  ;;  %s660_s7 = scalar_lea.vmem %s875_s17, 128  ;;  %p667_p1 = scmp.lt.s32.totalorder %s875_s17, %s665_s8 }
  0x1c   : > { %p661_p12 = scmp.ne.s32.totalorder %s875_s17, %s660_s7  ;;  %p668_p2 = scmp.lt.s32.totalorder %s666_s9, %s660_s7 }
  0x1d   : > { %v260_v9 = vpack.c.bf16 %v848_v6, %v848_v6  ;;  %v308_v10 = vsel %vm306_vm0, %v259_v7, 0 }
  0x1e   : > { %p662_p13 = pnand %p661_p12, %p812_p4  ;;  %p669_p3 = por %p668_p2, %p667_p1 }
  0x1f   : > { %572 = vmatprep.subr.msk.bf16.mxu0 %vm306_vm0, %v260_v9 }
  0x20   : > { %314 = vmatpush1.bf16.msra.mxu0 %v308_v10  ;;  %p663_p0 = pneg %p662_p13 }
  0x22   : > { %p670_p5 = pnand %p669_p3, %p663_p0 }
  0x23   : > { %573 = vmatmul.mubr.msk.bf16.vlgmr.msra.gmra.mrb[0].mxu0 %vm299_vm1, %v642_v11 }
  0x24   : > { %355 = vmatprep.mubr.bf16.mxu0 %v740_v0 }
  0x2b   : > { %574 = vmatmul.mubr.msk.bf16.gmra.mrb[4].mxu0 %vm299_vm1, %v643_v12 }
  0x90   : > { %v272_v13 = vpop.permute.xlu0 %271  ;;  %v282_v24 = vpop.permute.xlu1 %281 }
  0x94   : > { %v277_v17 = vpop.permute.xlu0 %276  ;;  %v287_v31 = vpop.permute.xlu1 %286 }
  0xf6   : > { %v347_v14 = vpop.f32.mrb[0].mxu0 }
  0xf7   : > { %v348_v15 = vadd.f32 %v347_v14, %v272_v13  ;;  %v349_v16 = vpop.f32.mrb[1].mxu0 }
  0xf8   : > { %v350_v18 = vadd.f32 %v349_v16, %v272_v13  ;;  %v351_v19 = vpop.f32.mrb[2].mxu0  ;;  %v415_v16 = vpop.permute.xlu0 %414 }
  0xf9   : > { %v374_v20 = vmul.f32 0.70710677, %v348_v15  ;;  %v352_v21 = vadd.f32 %v351_v19, %v277_v17  ;;  %v353_v22 = vpop.f32.mrb[3].mxu0  ;;  %v366_v47 = vmul.f32 0.5, %v348_v15  ;;  %v406_v15 = vld [vmem:[%s923_s3] sm:$0x3] }
  0xfa   : > { %v375_v23 = vmul.f32 0.70710677, %v350_v18  ;;  %v354_v25 = vadd.f32 %v353_v22, %v277_v17  ;;  %v367_v50 = vmul.f32 0.5, %v350_v18 }
  0xfb   : > { %644 = verf.f32 %v374_v20  ;;  %v376_v26 = vmul.f32 0.70710677, %v352_v21  ;;  %v368_v48 = vmul.f32 0.5, %v352_v21 }
  0xfc   : > { %646 = verf.f32 %v375_v23  ;;  %v377_v27 = vmul.f32 0.70710677, %v354_v25  ;;  %v369_v51 = vmul.f32 0.5, %v354_v25 }
  0xfd   : > { %648 = verf.f32 %v376_v26 }
  0xfe   : > { %650 = verf.f32 %v377_v27  ;;  %v357_v28 = vpop.f32.mrb[4].mxu0 }
  0xff   : > { %v358_v29 = vadd.f32 %v357_v28, %v282_v24  ;;  %v359_v30 = vpop.f32.mrb[5].mxu0 }
 0x100   : > { %v360_v32 = vadd.f32 %v359_v30, %v282_v24  ;;  %v361_v33 = vpop.f32.mrb[6].mxu0 }
 0x101   : > { %v378_v34 = vmul.f32 0.70710677, %v358_v29  ;;  %v362_v35 = vadd.f32 %v361_v33, %v287_v31  ;;  %v363_v36 = vpop.f32.mrb[7].mxu0  ;;  %v370_v1 = vmul.f32 0.5, %v358_v29 }
 0x102   : > { %v379_v37 = vmul.f32 0.70710677, %v360_v32  ;;  %v364_v38 = vadd.f32 %v363_v36, %v287_v31  ;;  %v371_v4 = vmul.f32 0.5, %v360_v32 }
 0x103   : > { %652 = verf.f32 %v378_v34  ;;  %v380_v39 = vmul.f32 0.70710677, %v362_v35  ;;  %v372_v2 = vmul.f32 0.5, %v362_v35 }
 0x104   : > { %654 = verf.f32 %v379_v37  ;;  %v381_v40 = vmul.f32 0.70710677, %v364_v38  ;;  %v373_v7 = vmul.f32 0.5, %v364_v38 }
 0x105   : > { %v645_v41 = vpop.eup %644  ;;  %656 = verf.f32 %v380_v39 }
 0x106   : > { %v647_v42 = vpop.eup %646  ;;  %658 = verf.f32 %v381_v40  ;;  %v390_v43 = vadd.f32 1.0, %v645_v41 }
 0x107   : > { %v649_v44 = vpop.eup %648  ;;  %v391_v45 = vadd.f32 1.0, %v647_v42 }
 0x108   : > { %v651_v46 = vpop.eup %650  ;;  %v392_v49 = vadd.f32 1.0, %v649_v44  ;;  %v398_v53 = vmul.f32 %v390_v43, %v366_v47 }
 0x109   : > { %v393_v52 = vadd.f32 1.0, %v651_v46  ;;  %v399_v55 = vmul.f32 %v391_v45, %v367_v50 }
 0x10a   : > { %v400_v54 = vmul.f32 %v392_v49, %v368_v48 }
 0x10b   : > { %v401_v56 = vmul.f32 %v393_v52, %v369_v51 }
 0x10c   : > { %v407_v57 = vpack.c.bf16 %v400_v54, %v398_v53 }
 0x10d   : > { %v653_v58 = vpop.eup %652  ;;  %v408_v59 = vpack.c.bf16 %v401_v56, %v399_v55 }
 0x10e   : > { %v655_v60 = vpop.eup %654  ;;  %v394_v61 = vadd.f32 1.0, %v653_v58 }
 0x10f   : > { %v657_v62 = vpop.eup %656  ;;  %v395_v63 = vadd.f32 1.0, %v655_v60  ;;  %421 = vmatprep.subr.bf16.mxu1 %v408_v59 }
 0x110   : > { %v659_v0 = vpop.eup %658  ;;  %v396_v3 = vadd.f32 1.0, %v657_v62  ;;  %422 = vmatpush1.bf16.msra.mxu1 %v407_v57  ;;  %v402_v9 = vmul.f32 %v394_v61, %v370_v1 }
 0x111   : > { %v397_v8 = vadd.f32 1.0, %v659_v0  ;;  %v403_v11 = vmul.f32 %v395_v63, %v371_v4 }
 0x112   : > { %v404_v10 = vmul.f32 %v396_v3, %v372_v2 }
 0x113   : > { %v405_v12 = vmul.f32 %v397_v8, %v373_v7 }
 0x114   : > { %v409_v13 = vpack.c.bf16 %v404_v10, %v402_v9 }
 0x115   : > { %v410_v14 = vpack.c.bf16 %v405_v12, %v403_v11 }
 0x117   : > { %423 = vmatprep.subr.bf16.mxu1 %v410_v14 }
 0x118   : > { %424 = vmatpush1.bf16.msra.mxu1 %v409_v13 }
 0x11b   : > { %575 = vmatmul.mubr.msk.bf16.vlgmr.msra.gmra.mrb[0].mxu1 %vm417_vm2, %v406_v15 }
 0x1ee   : > { %v455_v17 = vpop.f32.mrb[0].mxu1 }
 0x1ef   : > { %v456_v18 = vadd.f32 %v455_v17, %v415_v16  ;;  %v457_v19 = vpop.f32.mrb[1].mxu1 }
 0x1f0   : > { %v458_v20 = vadd.f32 %v457_v19, %v415_v16  ;;  %v459_v21 = vpop.f32.mrb[2].mxu1 }
 0x1f1   : > { %v462_v22 = vadd.f32 %v456_v18, %v844_v5  ;;  %v460_v23 = vpop.f32.mrb[3].mxu1 }
 0x1f2   : > { %v463_v24 = vadd.f32 %v458_v20, %v848_v6 }
 0x1f4   : > { %v466_v25 = vcombine.low %v462_v22, %v463_v24 }
 0x1f6   : > { %468 = vst [vmem:[%s242_s16] sm:$0xff] %v466_v25 }
 0x1f7   : > { %673 = shalt.err (!%p670_p5)
}
 0x1f8   : > { %s674_s10 = scalar_lea.hbm %s873_s27, 128  ;;  %s678_s13 = scalar_lea.hbm %s925_s5, 256 }
 0x1f9   : > { %p675_p6 = scmp.ne.s32.totalorder %s873_s27, %s674_s10  ;;  %p679_p10 = scmp.lt.u32.totalorder %s873_s27, %s925_s5 }
 0x1fa   : > { %p680_p11 = scmp.lt.u32.totalorder %s678_s13, %s674_s10  ;;  %p682_p13 = scmp.lt.u32.totalorder %s674_s10, %s873_s27 }
 0x1fb   : > { %p676_p7 = pnand %p675_p6, %p812_p4 }
 0x1fc   : > { %p681_p12 = por %p680_p11, %p679_p10 }
 0x1fd   : > { %p677_p9 = pneg %p676_p7 }
 0x1fe   : > { %p683_p0 = por %p682_p13, %p681_p12 }
 0x200   : > { %p684_p1 = pnand %p683_p0, %p677_p9 }
 0x202   : > { %687 = shalt.err (!%p684_p1)
}
 0x203   : > { %583 = dma.vmem_to_hbm [thread:$0]  (%p812_p4), %s875_s17, 128, %s873_s27, %s470_s29  }
 0x204 PF: > { %p589_p2 = scmp.ge.s32.totalorder %s738_s23, 2  ;;  %s498_s16 = sand.u32 1, %s718_s18  }
 0x205   : > { %s499_s24 = scalar_lea.sflag [#allocation3], %s498_s16 }
 0x206   : > { %p586_p3 = pnand %p589_p2, %p819_p8 }
 0x208   : > { %713 = dma.done.wait (!%p586_p3), %s499_s24, 128  }
 0x209   : > { %715 = vsyncadd (!%p586_p3), %s499_s24, 4294967168  ;;  %s18_s23 = sadd.s32 1, %s738_s23   ;;  %s928_s18 = smov %s722_s19 }
 0x20a   : > { %p15_p5 = scmp.ge.s32.totalorder %s18_s23, 4   ;;  %s929_s19 = smov %s726_s20 }
 0x20b   : > { %s930_s20 = smov %s825_s6  ;;  %s931_s21 = smov %s734_s22 }
 0x20c   : > { %s932_s22 = smov %s934_s26  ;;  %17 = sbr.rel (!%p15_p5) target bundleno = 4 (0x4), region = 75 }
 0x213   :  { %504 = vsyncpa [#allocation3], 1 }
 0x214   :  { %506 = vsyncpa [#allocation3 + $0x1], 1 }

// kernel: tpu_custom_call.1
= control target key start
LH: loop header
LB: loop body
LE: loop exit
PB: predicated region body
PF: predicated region fallthrough
CT: control target
= control target key end

     0   :  { %10 = vsyncpa [#allocation3], 0  ;;  %s920_s0 = inlined_call_operand.vmem [shape: f32[2,4,256], index: 0, kind: input, shape index: {}]   ;;  %s921_s1 = inlined_call_operand.vmem [shape: bf16[32,4], index: 1, kind: input, shape index: {}]   ;;  %s922_s2 = inlined_call_operand.vmem [shape: f32[32,1], index: 2, kind: input, shape index: {}]   ;;  %s923_s3 = inlined_call_operand.vmem [shape: bf16[4,32], index: 3, kind: input, shape index: {}]   ;;  %s924_s4 = inlined_call_operand.vmem [shape: f32[4,1], index: 4, kind: input, shape index: {}]   ;;  %s925_s5 = inlined_call_operand.hbm [shape: f32[2,4,256], index: 5, kind: output, shape index: {}]  }
   0x1   :  { %12 = vsyncpa [#allocation3 + $0x1], 0  ;;  %s772_s18 = smov 0   ;;  %s774_s19 = smov 0  }
   0x2   :  { %s776_s20 = smov 0   ;;  %s778_s21 = smov 0  }
   0x3   :  { %s780_s22 = smov 0   ;;  %s782_s23 = smov 0  }
   0x4 LB: > { %s562_s24 = sadd.s32 4294967295, %s738_s23   ;;  %s563_s25 = sadd.s32 4294967294, %s738_s23   ;;  %s738_s23 = sphi %s782_s23, %s18_s23   ;;  %s734_s22 = sphi %s780_s22, %s932_s22   ;;  %s730_s21 = sphi %s778_s21, %s931_s21   ;;  %s726_s20 = sphi %s776_s20, %s930_s20   ;;  %s722_s19 = sphi %s774_s19, %s929_s19   ;;  %s718_s18 = sphi %s772_s18, %s928_s18  }
   0x5   : > { %s30_s26 = sadd.s32 1, %s734_s22  ;;  %s151_s27 = sadd.s32 1, %s726_s20 }
   0x6   : > { %p32_p0 = scmp.ge.s32.totalorder %s30_s26, 2  ;;  %p161_p1 = scmp.ne.s32.totalorder %s726_s20, %s722_s19 }
   0x7   : > { %p162_p2 = scmp.eq.s32.totalorder %s562_s24, 1  ;;  %p167_p3 = scmp.ne.s32.totalorder %s722_s19, %s718_s18 }
   0x8   : > { %s934_s26 = smov (%p32_p0, %s30_s26), 0  ;;  %p168_p5 = scmp.eq.s32.totalorder %s563_s25, 1 }
   0x9   : > { %p812_p4 = por %p162_p2, %p161_p1  ;;  %s146_s29 = ssub.s32 %s734_s22, %s934_s26 }
   0xa   : > { %p566_p6 = scmp.ge.s32.totalorder %s738_s23, 1  ;;  %p149_p7 = scmp.eq.s32.totalorder %s146_s29, 0 }
   0xb   : > { %p819_p8 = por %p168_p5, %p167_p3  ;;  %p211_p9 = scmp.lt.s32.totalorder %s738_s23, 3 }
   0xc   : > { %s825_s6 = scalar_select %p149_p7, %s726_s20, %s151_s27  }
   0xd   : > { %p212_p10 = pnand %p566_p6, %p211_p9 }
   0xe   : > { %p244_p11 = scmp.lt.s32.totalorder (!%p212_p10), %s730_s21, 1  ;;  %v740_v0 = vmov (!%p212_p10), 0   ;;  %v265_v1 = vld [vmem:[%s922_s2] sm:$0xff] (!%p212_p10)  ;;  %v267_v2 = vld [vmem:[%s922_s2 + $0x10] sm:$0xff] (!%p212_p10)  ;;  %v266_v3 = vld [vmem:[%s922_s2 + $0x8] sm:$0xff] (!%p212_p10)  ;;  %vm306_vm0 = vcmask (!%p212_p10), 1041408  }
   0xf   : > { %215 = sbr.rel (%p212_p10) target bundleno = 516 (0x204), region = 40  ;;  %345 = vmatprep.mubr.bf16.mxu0 (!%p212_p10), %v740_v0  ;;  %639 = vset.pattern.permute.xlu0 (!%p212_p10), %v740_v0  ;;  %v268_v4 = vld [vmem:[%s922_s2 + $0x18] sm:$0xff] (!%p212_p10)  ;;  %v411_v8 = vld [vmem:[%s924_s4] sm:$0xf] (!%p212_p10)  ;;  %vm299_vm1 = vcmask (!%p212_p10), 31744   ;;  %v643_v12 = vld [vmem:[%s921_s1 + $0x8] sm:$0xff] (!%p212_p10)  }
  0x10   : > { %640 = vset.pattern.permute.xlu1 (!%p212_p10), %v740_v0  ;;  %453 = vmatprep.mubr.bf16.mxu1 (!%p212_p10), %v740_v0  ;;  %v642_v11 = vld [vmem:[%s921_s1] sm:$0xff] (!%p212_p10)   ;;  %vm417_vm2 = vcmask (!%p212_p10), 261120   ;;  %s240_s13 = sand.u32 (!%p212_p10), 1, %s722_s19   ;;  %s582_s15 = sshll.u32 (!%p212_p10), %s730_s21, 7 }
  0x11   : > { %271 = vperm.xlu0 (!%p212_p10), %639, %v265_v1   ;;  %281 = vperm.xlu1 (!%p212_p10), %640, %v267_v2   ;;  %s567_s14 = sshll.u32 (!%p212_p10), %s240_s13, 3  ;;  %s873_s27 = scalar_lea.hbm (!%p212_p10), %s925_s5, %s582_s15 }
  0x12   : > { %s242_s16 = scalar_lea.vmem (!%p212_p10), [#allocation2], %s567_s14  ;;  %s470_s29 = scalar_lea.sflag (!%p212_p10), [#allocation3], %s240_s13 }
  0x15   : > { %276 = vperm.xlu0 (!%p212_p10), %639, %v266_v3   ;;  %286 = vperm.xlu1 (!%p212_p10), %640, %v268_v4  }
  0x16   : > { %s245_s7 = scalar_select %p244_p11, %s730_s21, 1 }
  0x17   : > { %s741_s21 = smov [#allocation2]  }
  0x18   : > { %s581_s12 = sshll.u32 %s245_s7, 3  ;;  %s664_s8 = sshll.u32 %s741_s21, 4  ;;  %s665_s8 = int_to_ptr.vmem [resolvable:$false] %s664_s8 }
  0x19   : > { %s251_s17 = scalar_lea.vmem %s920_s0, %s581_s12  ;;  %414 = vperm.xlu0 %639, %v411_v8   ;;  %s666_s9 = scalar_lea.vmem %s665_s8, 256 }
  0x1a   : > { %v844_v5 = vld [vmem:[%s251_s17] sm:$0xff]  ;;  %s486_s17 = sshll.u32 %s242_s16, 4  ;;  %s875_s17 = int_to_ptr.vmem [resolvable:$true] %s486_s17 }
  0x1b   : > { %v848_v6 = vcombine.high %v844_v5, %v844_v5  ;;  %v259_v7 = vpack.c.bf16 %v844_v5, %v844_v5  ;;  %s660_s7 = scalar_lea.vmem %s875_s17, 128  ;;  %p667_p1 = scmp.lt.s32.totalorder %s875_s17, %s665_s8 }
  0x1c   : > { %p661_p12 = scmp.ne.s32.totalorder %s875_s17, %s660_s7  ;;  %p668_p2 = scmp.lt.s32.totalorder %s666_s9, %s660_s7 }
  0x1d   : > { %v260_v9 = vpack.c.bf16 %v848_v6, %v848_v6  ;;  %v308_v10 = vsel %vm306_vm0, %v259_v7, 0 }
  0x1e   : > { %p662_p13 = pnand %p661_p12, %p812_p4  ;;  %p669_p3 = por %p668_p2, %p667_p1 }
  0x1f   : > { %572 = vmatprep.subr.msk.bf16.mxu0 %vm306_vm0, %v260_v9 }
  0x20   : > { %314 = vmatpush1.bf16.msra.mxu0 %v308_v10  ;;  %p663_p0 = pneg %p662_p13 }
  0x22   : > { %p670_p5 = pnand %p669_p3, %p663_p0 }
  0x23   : > { %573 = vmatmul.mubr.msk.bf16.vlgmr.msra.gmra.mrb[0].mxu0 %vm299_vm1, %v642_v11 }
  0x24   : > { %355 = vmatprep.mubr.bf16.mxu0 %v740_v0 }
  0x2b   : > { %574 = vmatmul.mubr.msk.bf16.gmra.mrb[4].mxu0 %vm299_vm1, %v643_v12 }
  0x90   : > { %v272_v13 = vpop.permute.xlu0 %271  ;;  %v282_v24 = vpop.permute.xlu1 %281 }
  0x94   : > { %v277_v17 = vpop.permute.xlu0 %276  ;;  %v287_v31 = vpop.permute.xlu1 %286 }
  0xf6   : > { %v347_v14 = vpop.f32.mrb[0].mxu0 }
  0xf7   : > { %v348_v15 = vadd.f32 %v347_v14, %v272_v13  ;;  %v349_v16 = vpop.f32.mrb[1].mxu0 }
  0xf8   : > { %v350_v18 = vadd.f32 %v349_v16, %v272_v13  ;;  %v351_v19 = vpop.f32.mrb[2].mxu0  ;;  %v415_v16 = vpop.permute.xlu0 %414 }
  0xf9   : > { %v374_v20 = vmul.f32 0.70710677, %v348_v15  ;;  %v352_v21 = vadd.f32 %v351_v19, %v277_v17  ;;  %v353_v22 = vpop.f32.mrb[3].mxu0  ;;  %v366_v47 = vmul.f32 0.5, %v348_v15  ;;  %v406_v15 = vld [vmem:[%s923_s3] sm:$0x3] }
  0xfa   : > { %v375_v23 = vmul.f32 0.70710677, %v350_v18  ;;  %v354_v25 = vadd.f32 %v353_v22, %v277_v17  ;;  %v367_v50 = vmul.f32 0.5, %v350_v18 }
  0xfb   : > { %644 = verf.f32 %v374_v20  ;;  %v376_v26 = vmul.f32 0.70710677, %v352_v21  ;;  %v368_v48 = vmul.f32 0.5, %v352_v21 }
  0xfc   : > { %646 = verf.f32 %v375_v23  ;;  %v377_v27 = vmul.f32 0.70710677, %v354_v25  ;;  %v369_v51 = vmul.f32 0.5, %v354_v25 }
  0xfd   : > { %648 = verf.f32 %v376_v26 }
  0xfe   : > { %650 = verf.f32 %v377_v27  ;;  %v357_v28 = vpop.f32.mrb[4].mxu0 }
  0xff   : > { %v358_v29 = vadd.f32 %v357_v28, %v282_v24  ;;  %v359_v30 = vpop.f32.mrb[5].mxu0 }
 0x100   : > { %v360_v32 = vadd.f32 %v359_v30, %v282_v24  ;;  %v361_v33 = vpop.f32.mrb[6].mxu0 }
 0x101   : > { %v378_v34 = vmul.f32 0.70710677, %v358_v29  ;;  %v362_v35 = vadd.f32 %v361_v33, %v287_v31  ;;  %v363_v36 = vpop.f32.mrb[7].mxu0  ;;  %v370_v1 = vmul.f32 0.5, %v358_v29 }
 0x102   : > { %v379_v37 = vmul.f32 0.70710677, %v360_v32  ;;  %v364_v38 = vadd.f32 %v363_v36, %v287_v31  ;;  %v371_v4 = vmul.f32 0.5, %v360_v32 }
 0x103   : > { %652 = verf.f32 %v378_v34  ;;  %v380_v39 = vmul.f32 0.70710677, %v362_v35  ;;  %v372_v2 = vmul.f32 0.5, %v362_v35 }
 0x104   : > { %654 = verf.f32 %v379_v37  ;;  %v381_v40 = vmul.f32 0.70710677, %v364_v38  ;;  %v373_v7 = vmul.f32 0.5, %v364_v38 }
 0x105   : > { %v645_v41 = vpop.eup %644  ;;  %656 = verf.f32 %v380_v39 }
 0x106   : > { %v647_v42 = vpop.eup %646  ;;  %658 = verf.f32 %v381_v40  ;;  %v390_v43 = vadd.f32 1.0, %v645_v41 }
 0x107   : > { %v649_v44 = vpop.eup %648  ;;  %v391_v45 = vadd.f32 1.0, %v647_v42 }
 0x108   : > { %v651_v46 = vpop.eup %650  ;;  %v392_v49 = vadd.f32 1.0, %v649_v44  ;;  %v398_v53 = vmul.f32 %v390_v43, %v366_v47 }
 0x109   : > { %v393_v52 = vadd.f32 1.0, %v651_v46  ;;  %v399_v55 = vmul.f32 %v391_v45, %v367_v50 }
 0x10a   : > { %v400_v54 = vmul.f32 %v392_v49, %v368_v48 }
 0x10b   : > { %v401_v56 = vmul.f32 %v393_v52, %v369_v51 }
 0x10c   : > { %v407_v57 = vpack.c.bf16 %v400_v54, %v398_v53 }
 0x10d   : > { %v653_v58 = vpop.eup %652  ;;  %v408_v59 = vpack.c.bf16 %v401_v56, %v399_v55 }
 0x10e   : > { %v655_v60 = vpop.eup %654  ;;  %v394_v61 = vadd.f32 1.0, %v653_v58 }
 0x10f   : > { %v657_v62 = vpop.eup %656  ;;  %v395_v63 = vadd.f32 1.0, %v655_v60  ;;  %421 = vmatprep.subr.bf16.mxu1 %v408_v59 }
 0x110   : > { %v659_v0 = vpop.eup %658  ;;  %v396_v3 = vadd.f32 1.0, %v657_v62  ;;  %422 = vmatpush1.bf16.msra.mxu1 %v407_v57  ;;  %v402_v9 = vmul.f32 %v394_v61, %v370_v1 }
 0x111   : > { %v397_v8 = vadd.f32 1.0, %v659_v0  ;;  %v403_v11 = vmul.f32 %v395_v63, %v371_v4 }
 0x112   : > { %v404_v10 = vmul.f32 %v396_v3, %v372_v2 }
 0x113   : > { %v405_v12 = vmul.f32 %v397_v8, %v373_v7 }
 0x114   : > { %v409_v13 = vpack.c.bf16 %v404_v10, %v402_v9 }
 0x115   : > { %v410_v14 = vpack.c.bf16 %v405_v12, %v403_v11 }
 0x117   : > { %423 = vmatprep.subr.bf16.mxu1 %v410_v14 }
 0x118   : > { %424 = vmatpush1.bf16.msra.mxu1 %v409_v13 }
 0x11b   : > { %575 = vmatmul.mubr.msk.bf16.vlgmr.msra.gmra.mrb[0].mxu1 %vm417_vm2, %v406_v15 }
 0x1ee   : > { %v455_v17 = vpop.f32.mrb[0].mxu1 }
 0x1ef   : > { %v456_v18 = vadd.f32 %v455_v17, %v415_v16  ;;  %v457_v19 = vpop.f32.mrb[1].mxu1 }
 0x1f0   : > { %v458_v20 = vadd.f32 %v457_v19, %v415_v16  ;;  %v459_v21 = vpop.f32.mrb[2].mxu1 }
 0x1f1   : > { %v462_v22 = vadd.f32 %v456_v18, %v844_v5  ;;  %v460_v23 = vpop.f32.mrb[3].mxu1 }
 0x1f2   : > { %v463_v24 = vadd.f32 %v458_v20, %v848_v6 }
 0x1f4   : > { %v466_v25 = vcombine.low %v462_v22, %v463_v24 }
 0x1f6   : > { %468 = vst [vmem:[%s242_s16] sm:$0xff] %v466_v25 }
 0x1f7   : > { %673 = shalt.err (!%p670_p5)
}
 0x1f8   : > { %s674_s10 = scalar_lea.hbm %s873_s27, 128  ;;  %s678_s13 = scalar_lea.hbm %s925_s5, 256 }
 0x1f9   : > { %p675_p6 = scmp.ne.s32.totalorder %s873_s27, %s674_s10  ;;  %p679_p10 = scmp.lt.u32.totalorder %s873_s27, %s925_s5 }
 0x1fa   : > { %p680_p11 = scmp.lt.u32.totalorder %s678_s13, %s674_s10  ;;  %p682_p13 = scmp.lt.u32.totalorder %s674_s10, %s873_s27 }
 0x1fb   : > { %p676_p7 = pnand %p675_p6, %p812_p4 }
 0x1fc   : > { %p681_p12 = por %p680_p11, %p679_p10 }
 0x1fd   : > { %p677_p9 = pneg %p676_p7 }
 0x1fe   : > { %p683_p0 = por %p682_p13, %p681_p12 }
 0x200   : > { %p684_p1 = pnand %p683_p0, %p677_p9 }
 0x202   : > { %687 = shalt.err (!%p684_p1)
}
 0x203   : > { %583 = dma.vmem_to_hbm [thread:$0]  (%p812_p4), %s875_s17, 128, %s873_s27, %s470_s29  }
 0x204 PF: > { %p589_p2 = scmp.ge.s32.totalorder %s738_s23, 2  ;;  %s498_s16 = sand.u32 1, %s718_s18  }
 0x205   : > { %s499_s24 = scalar_lea.sflag [#allocation3], %s498_s16 }
 0x206   : > { %p586_p3 = pnand %p589_p2, %p819_p8 }
 0x208   : > { %713 = dma.done.wait (!%p586_p3), %s499_s24, 128  }
 0x209   : > { %715 = vsyncadd (!%p586_p3), %s499_s24, 4294967168  ;;  %s18_s23 = sadd.s32 1, %s738_s23   ;;  %s928_s18 = smov %s722_s19 }
 0x20a   : > { %p15_p5 = scmp.ge.s32.totalorder %s18_s23, 4   ;;  %s929_s19 = smov %s726_s20 }
 0x20b   : > { %s930_s20 = smov %s825_s6  ;;  %s931_s21 = smov %s734_s22 }
 0x20c   : > { %s932_s22 = smov %s934_s26  ;;  %17 = sbr.rel (!%p15_p5) target bundleno = 4 (0x4), region = 75 }
 0x213   :  { %504 = vsyncpa [#allocation3], 1 }
 0x214   :  { %506 = vsyncpa [#allocation3 + $0x1], 1 }

</bundles_post_ra>
